<compile_context>
chip_gen: v6e
topology: v6e:2x2x1
jax: 0.10.0
libtpu: 0.0.40
codegen_flags: <defaults>
</compile_context>

<pallas_src>
import functools
import math

import jax
import jax.numpy as jnp
from jax.experimental import pallas as pl
from jax.experimental.pallas import tpu as pltpu


# --------------------------------------------------------------------------
# Kernels
# --------------------------------------------------------------------------
def _gwl_kernel_full(x_ref, w_ref, b_ref, o_ref):
    """td == D: one hidden chunk per batch tile, no accumulator needed.

    x_ref: (tb, C, D), w_ref: (1, C, D), b_ref: (1, C), o_ref: (tb, C)
    """
    x = x_ref[...].astype(jnp.float32)
    w = w_ref[...].astype(jnp.float32)
    o_ref[...] = (jnp.sum(x * w, axis=-1)
                  + b_ref[...].astype(jnp.float32)).astype(o_ref.dtype)


def _gwl_kernel_chunked(x_ref, w_ref, b_ref, o_ref, acc_ref, *, td,
                        w_resident):
    """Hidden dim chunked across grid axis 1 (reduction, 'arbitrary').

    x_ref:   (tb, C, td)             input chunk
    w_ref:   (1, C, D) if w_resident (fetched once, constant index_map)
             (1, C, td) otherwise
    b_ref:   (1, C)
    o_ref:   (tb, C)                 written on the last hidden chunk
    acc_ref: (tb, C) f32             running partial sums (VMEM scratch)
    """
    k = pl.program_id(1)

    if w_resident:
        start = pl.multiple_of(k * td, td)
        w = w_ref[:, :, pl.ds(start, td)]
    else:
        w = w_ref[...]

    # Widen before the multiply (matches reference numerics), reduce the
    # hidden chunk; only the (tb, C) f32 partial sums stay live across chunks.
    psum = jnp.sum(x_ref[...].astype(jnp.float32) * w.astype(jnp.float32),
                   axis=-1)

    @pl.when(k == 0)
    def _first():
        acc_ref[...] = psum            # assign: no redundant zero + RMW

    @pl.when(k > 0)
    def _rest():
        acc_ref[...] += psum

    @pl.when(k == pl.num_programs(1) - 1)
    def _finalize():
        o_ref[...] = (acc_ref[...]
                      + b_ref[...].astype(jnp.float32)).astype(o_ref.dtype)


# --------------------------------------------------------------------------
# Tiling helpers
# --------------------------------------------------------------------------
def _divisors(n):
    return [d for d in range(1, n + 1) if n % d == 0]


def _vmem_capacity_bytes():
    try:
        info = pltpu.get_tpu_info()
        cap = getattr(info, "vmem_capacity_bytes", None)
        if cap:
            return int(cap)
    except Exception:
        pass
    return 64 << 20  # conservative default: v7x per-core physical VMEM


def _sublane_multiple(itemsize):
    # f32 -> 8, bf16/f16 -> 16, int8/fp8 -> 32 (sub-32-bit sublane packing).
    return max(8, 32 // max(1, itemsize))


def _choose_tiles(B, C, D, itemsize, target_bytes, sublane):
    """Pick (tb, td) so each x block is ~target_bytes and obeys tiling rules.

      * td (lane dim of the x block) must be a multiple of 128 or == D,
      * tb (sublane dim of the output block) must be a multiple of 8 or == B
        (we prefer a multiple of the dtype's packing factor),
      * tb | B and td | D so every grid step sees a full block.
    """
    divs = _divisors(B)
    tb_cands = [d for d in divs if d % sublane == 0]   # packing-aligned
    if not tb_cands:
        tb_cands = [d for d in divs if d % 8 == 0]     # still legal
    if not tb_cands:
        tb_cands = [B]                                 # full-dim fallback
    min_tb = min(tb_cands)

    row_bytes = C * D * itemsize  # one batch element, full hidden dim

    if min_tb * row_bytes <= target_bytes:
        # Full hidden dim fits in one block.
        td = D
        fitting = [t for t in tb_cands if t * row_bytes <= target_bytes]
        if not fitting:
            fitting = [min_tb]
        # Prefer >= 4 batch steps (pipeline overlap + both v7x cores busy),
        # then >= 2, then whatever fits.
        for min_steps in (4, 2, 1):
            ok = [t for t in fitting if B // t >= min_steps]
            if ok:
                return max(ok), td
        return min_tb, td

    # Hidden dim must be chunked: smallest legal batch tile, and the largest
    # 128-aligned hidden chunk that fits (long contiguous DMA runs).
    tb = min_tb
    lane_cands = [d for d in _divisors(D) if d % 128 == 0]
    fitting = [d for d in lane_cands if tb * C * d * itemsize <= target_bytes]
    if fitting:
        td = max(fitting)
    elif lane_cands:
        td = min(lane_cands)
    else:
        td = D  # D not 128-divisible: cannot chunk legally, take it whole
    return tb, td


# --------------------------------------------------------------------------
# Wrapper
# --------------------------------------------------------------------------
def group_wise_linear(x, W, b=None, *, batch_tile=None, hidden_tile=None):
    """x: [B, C, D], W: [1, C, D], b: [1, C] or None -> [B, C]."""
    B, C, D = x.shape
    assert W.shape == (1, C, D), (W.shape, (1, C, D))
    if b is None:
        b = jnp.zeros((1, C), dtype=x.dtype)
    assert b.shape == (1, C), (b.shape, (1, C))

    itemsize = jnp.dtype(x.dtype).itemsize
    w_itemsize = jnp.dtype(W.dtype).itemsize
    sublane = _sublane_multiple(itemsize)

    vmem_cap = _vmem_capacity_bytes()
    # ~8 MiB x blocks on v7x (64 MiB/TC), ~16 MiB on v5e/v6e (128 MiB);
    # double-buffered they stay well inside VMEM and amortize the ~0.35 us
    # fixed per-grid-step overhead even at 3.2 TB/s HBM.
    target_bytes = min(32 << 20, max(8 << 20, vmem_cap // 8))

    tb, td = _choose_tiles(B, C, D, itemsize, target_bytes, sublane)
    if batch_tile is not None:
        tb = int(batch_tile)
    if hidden_tile is not None:
        td = int(hidden_tile)

    # Validate tiles against divisibility AND the (8,128)-or-full-dim rule.
    if B % tb != 0 or D % td != 0:
        raise ValueError(f"tiles must divide dims: B={B} tb={tb} D={D} td={td}")
    if tb != B and tb % 8 != 0:
        raise ValueError(f"batch_tile {tb} must be a multiple of 8 or == B={B}")
    if td != D and td % 128 != 0:
        raise ValueError(f"hidden_tile {td} must be a multiple of 128 or == D={D}")

    single_chunk = (td == D)
    w_bytes_full = C * D * w_itemsize
    # Keep W resident in VMEM (fetched once, constant index_map) when it fits
    # comfortably alongside the double-buffered x blocks.
    w_resident = single_chunk or (w_bytes_full <= max(4 << 20, target_bytes))

    # Scoped-VMEM request: double-buffered x blocks + W + bias + output +
    # accumulator + headroom for the widened (f32) product intermediate.
    x_blk = tb * C * td * itemsize
    w_blk = w_bytes_full if w_resident else C * td * w_itemsize
    b_blk = C * jnp.dtype(b.dtype).itemsize
    o_blk = tb * C * itemsize
    acc_blk = 0 if single_chunk else tb * C * 4
    prod_scratch = tb * C * td * 4
    needed = (2 * x_blk + 2 * w_blk + 2 * (b_blk + o_blk)
              + acc_blk + prod_scratch + (2 << 20))
    vmem_limit = int(min(vmem_cap,
                         max(needed, min(32 << 20, int(vmem_cap * 0.9)))))

    w_traffic = (w_bytes_full if w_resident
                 else (B // tb) * C * D * w_itemsize)
    cost = pl.CostEstimate(
        flops=2 * B * C * D,
        transcendentals=0,
        bytes_accessed=(B * C * D * itemsize          # x
                        + w_traffic                   # W
                        + C * jnp.dtype(b.dtype).itemsize
                        + B * C * itemsize),          # output
    )

    out_shape = jax.ShapeDtypeStruct((B, C), x.dtype)

    if single_chunk:
        grid_spec = pltpu.PrefetchScalarGridSpec(
            num_scalar_prefetch=0,
            grid=(B // tb,),
            in_specs=[
                pl.BlockSpec((tb, C, D), lambda i: (i, 0, 0)),
                pl.BlockSpec((1, C, D), lambda i: (0, 0, 0)),   # resident W
                pl.BlockSpec((1, C), lambda i: (0, 0)),
            ],
            out_specs=pl.BlockSpec((tb, C), lambda i: (i, 0)),
            scratch_shapes=[],
        )
        kernel = _gwl_kernel_full
        dim_sem = ("parallel",)
    else:
        if w_resident:
            w_spec = pl.BlockSpec((1, C, D), lambda i, k: (0, 0, 0))
        else:
            w_spec = pl.BlockSpec((1, C, td), lambda i, k: (0, 0, k))
        grid_spec = pltpu.PrefetchScalarGridSpec(
            num_scalar_prefetch=0,
            grid=(B // tb, D // td),          # reduction axis (D) last
            in_specs=[
                pl.BlockSpec((tb, C, td), lambda i, k: (i, 0, k)),
                w_spec,
                pl.BlockSpec((1, C), lambda i, k: (0, 0)),
            ],
            out_specs=pl.BlockSpec((tb, C), lambda i, k: (i, 0)),
            scratch_shapes=[pltpu.VMEM((tb, C), jnp.float32)],
        )
        kernel = functools.partial(_gwl_kernel_chunked, td=td,
                                   w_resident=w_resident)
        dim_sem = ("parallel", "arbitrary")

    return pl.pallas_call(
        kernel,
        out_shape=out_shape,
        grid_spec=grid_spec,
        compiler_params=pltpu.CompilerParams(
            dimension_semantics=dim_sem,
            vmem_limit_bytes=vmem_limit,
        ),
        cost_estimate=cost,
    )(x, W, b)


def reference(x, W, b):
    out = jnp.sum(W.astype(jnp.float32) * x.astype(jnp.float32), axis=-1)
    if b is not None:
        out = out + b.astype(jnp.float32)
    return out


if __name__ == "__main__":
    # Small shapes consistent with the module: batch=2, num_class=8, hidden=32
    B, num_class, hidden_dim = 2, 8, 32

    key = jax.random.PRNGKey(0)
    kx, kw, kb = jax.random.split(key, 3)

    # Deterministic parameter init matching reset_parameters():
    # uniform(-stdv, stdv) with stdv = 1/sqrt(hidden_dim)
    stdv = 1.0 / math.sqrt(hidden_dim)
    W = jax.random.uniform(kw, (1, num_class, hidden_dim),
                           minval=-stdv, maxval=stdv, dtype=jnp.float32)
    b = jax.random.uniform(kb, (1, num_class),
                           minval=-stdv, maxval=stdv, dtype=jnp.float32)

    x = jax.random.normal(kx, (B, num_class, hidden_dim), dtype=jnp.float32)

    out = group_wise_linear(x, W, b)
    out = jax.block_until_ready(out)

    ref = reference(x, W, b)
    assert out.shape == (B, num_class)
    assert jnp.allclose(out, ref, atol=1e-5, rtol=1e-5), (out, ref)

    print("KERNEL_OK")
</pallas_src>

<mosaic_0001>
module attributes {stable_mosaic.version = 11 : i64} {
  func.func @_gwl_kernel_full(%arg0: i32, %arg1: memref<2x8x32xf32, #tpu.memory_space<vmem>>, %arg2: memref<1x8x32xf32, #tpu.memory_space<vmem>>, %arg3: memref<1x8xf32, #tpu.memory_space<vmem>>, %arg4: memref<2x8xf32, #tpu.memory_space<vmem>>) attributes {dimension_semantics = [#tpu.dimension_semantics<parallel>], iteration_bounds = array<i64: 1>, scalar_prefetch = 0 : i64, scratch_operands = 0 : i64, tpu.core_type = #tpu.core_type<tc>, window_params = [{transform_indices = @transform_0, window_bounds = array<i64: 2, 8, 32>}, {pipeline_mode = #tpu.pipeline_mode<synchronous>, transform_indices = @transform_1, window_bounds = array<i64: 1, 8, 32>}, {pipeline_mode = #tpu.pipeline_mode<synchronous>, transform_indices = @transform_2, window_bounds = array<i64: 1, 8>}, {transform_indices = @transform_3, window_bounds = array<i64: 2, 8>}]} {
    %c0 = arith.constant 0 : index
    %c0_0 = arith.constant 0 : index
    %c0_1 = arith.constant 0 : index
    %0 = vector.load %arg1[%c0, %c0_0, %c0_1] : memref<2x8x32xf32, #tpu.memory_space<vmem>>, vector<2x8x32xf32>
    %c0_2 = arith.constant 0 : index
    %c0_3 = arith.constant 0 : index
    %c0_4 = arith.constant 0 : index
    %1 = vector.load %arg2[%c0_2, %c0_3, %c0_4] : memref<1x8x32xf32, #tpu.memory_space<vmem>>, vector<1x8x32xf32>
    %2 = vector.broadcast %1 : vector<1x8x32xf32> to vector<2x8x32xf32>
    %3 = arith.mulf %0, %2 : vector<2x8x32xf32>
    %cst = arith.constant dense<0.000000e+00> : vector<2x8xf32>
    %4 = vector.multi_reduction <add>, %3, %cst [2] : vector<2x8x32xf32> to vector<2x8xf32>
    %c0_5 = arith.constant 0 : index
    %c0_6 = arith.constant 0 : index
    %5 = vector.load %arg3[%c0_5, %c0_6] : memref<1x8xf32, #tpu.memory_space<vmem>>, vector<1x8xf32>
    %6 = vector.broadcast %5 : vector<1x8xf32> to vector<2x8xf32>
    %7 = arith.addf %4, %6 : vector<2x8xf32>
    %c0_7 = arith.constant 0 : index
    %c0_8 = arith.constant 0 : index
    %8 = vector.load %arg4[%c0_7, %c0_8] : memref<2x8xf32, #tpu.memory_space<vmem>>, vector<2x8xf32>
    tpu.vector_store %arg4[%c0_7, %c0_8], %7 {strides = array<i32>} : memref<2x8xf32, #tpu.memory_space<vmem>>, vector<2x8xf32>,
    return
  }
  func.func @transform_0(%arg0: i32) -> (i32, i32, i32) {
    %c0_i32 = arith.constant 0 : i32
    %c0_i32_0 = arith.constant 0 : i32
    %c0_i32_1 = arith.constant 0 : i32
    return %arg0, %c0_i32, %c0_i32_0 : i32, i32, i32
  }
  func.func @transform_1(%arg0: i32) -> (i32, i32, i32) {
    %c0_i32 = arith.constant 0 : i32
    %c0_i32_0 = arith.constant 0 : i32
    %c0_i32_1 = arith.constant 0 : i32
    %c0_i32_2 = arith.constant 0 : i32
    return %c0_i32, %c0_i32_0, %c0_i32_1 : i32, i32, i32
  }
  func.func @transform_2(%arg0: i32) -> (i32, i32) {
    %c0_i32 = arith.constant 0 : i32
    %c0_i32_0 = arith.constant 0 : i32
    %c0_i32_1 = arith.constant 0 : i32
    return %c0_i32, %c0_i32_0 : i32, i32
  }
  func.func @transform_3(%arg0: i32) -> (i32, i32) {
    %c0_i32 = arith.constant 0 : i32
    %c0_i32_0 = arith.constant 0 : i32
    return %arg0, %c0_i32 : i32, i32
  }
}

</mosaic_0001>

<bundles_post_ra>
// kernel: tpu_custom_call.1
= control target key start
LH: loop header
LB: loop body
LE: loop exit
PB: predicated region body
PF: predicated region fallthrough
CT: control target
= control target key end

     0   :  { %8 = vsyncpa [#allocation3], 0  ;;  %s217_s0 = inlined_call_operand.hbm [shape: f32[2,8,32], index: 0, kind: input, shape index: {}]   ;;  %s218_s1 = inlined_call_operand.hbm [shape: f32[1,8,32], index: 1, kind: input, shape index: {}]   ;;  %s219_s2 = inlined_call_operand.vmem [shape: f32[1,8], index: 2, kind: input, shape index: {}]   ;;  %s220_s3 = inlined_call_operand.hbm [shape: f32[2,8], index: 3, kind: output, shape index: {}]  }
   0x1   :  { %9 = vsyncpa [#allocation6], 0 }
   0x2   :  { %10 = vsyncpa [#allocation4], 0  ;;  %s179_s12 = smov [#allocation2]  }
   0x3   :  { %s16_s13 = sshll.u32 %s179_s12, 4  ;;  %s17_s13 = int_to_ptr.vmem [resolvable:$true] %s16_s13 }
   0x4   :  { %s121_s14 = scalar_lea.vmem %s17_s13, 256  ;;  %p126_p1 = scmp.lt.s32.totalorder %s17_s13, %s17_s13 }
   0x5   :  { %p122_p0 = scmp.ne.s32.totalorder %s17_s13, %s121_s14  ;;  %p127_p2 = scmp.lt.s32.totalorder %s121_s14, %s121_s14 }
   0x7   :  { %p128_p3 = por %p127_p2, %p126_p1 }
   0x9   :  { %p129_p4 = pnand %p128_p3, %p122_p0 }
   0xb   :  { %132 = shalt.err (!%p129_p4)
}
   0xc   :  { %s180_s15 = smov 128   ;;  %s181_s16 = smov 8  }
   0xd   :  { %22 = dma.hbm_to_vmem [thread:$0]  %s217_s0, 256, %s17_s13, [#allocation3], %s180_s15, %s180_s15, %s181_s16  }
   0xe   :  { %s182_s19 = smov [#allocation5]  }
   0xf   :  { %s29_s20 = sshll.u32 %s182_s19, 4  ;;  %s30_s20 = int_to_ptr.vmem [resolvable:$true] %s29_s20 }
  0x10   :  { %s141_s21 = scalar_lea.vmem %s30_s20, 128  ;;  %p146_p6 = scmp.lt.s32.totalorder %s30_s20, %s30_s20 }
  0x11   :  { %p142_p5 = scmp.ne.s32.totalorder %s30_s20, %s141_s21  ;;  %p147_p7 = scmp.lt.s32.totalorder %s141_s21, %s141_s21 }
  0x13   :  { %p148_p8 = por %p147_p7, %p146_p6 }
  0x15   :  { %p149_p9 = pnand %p148_p8, %p142_p5 }
  0x17   :  { %152 = shalt.err (!%p149_p9)
}
  0x18   :  { %32 = dma.hbm_to_vmem [thread:$0]  %s218_s1, 128, %s30_s20, [#allocation6]  }
  0x19   :  { %173 = dma.done.wait [#allocation3], 256  }
  0x1a   :  { %174 = vsyncadd [#allocation3], 4294967040 }
  0x1b   :  { %175 = dma.done.wait [#allocation6], 128  }
  0x1c   :  { %176 = vsyncadd [#allocation6], 4294967168  ;;  %v41_v0 = vld [vmem:[#allocation2] sm:$0xff]  ;;  %v43_v1 = vld [vmem:[#allocation5] sm:$0xff]  ;;  %vm46_vm0 = vcmask 261120   ;;  %v183_v8 = vmov 0   ;;  %v73_v14 = vlaneseq }
  0x1d   :  { %v42_v2 = vld [vmem:[#allocation2 + $0x8] sm:$0xff]  ;;  %v44_v3 = vmul.f32 %v43_v1, %v41_v0  ;;  %v104_v5 = vld [vmem:[%s219_s2] ss:$0 sm:$0xff]  ;;  %111 = vset.pattern.permute.xlu1 %v183_v8  ;;  %112 = vset.pattern.permute.xlu0 %v183_v8  ;;  %s184_s1 = smov [#allocation7]   ;;  %vm83_vm1 = vcmask 1041409   ;;  %vm86_vm2 = vcmask 58368  }
  0x1e   :  { %v45_v4 = vmul.f32 %v43_v1, %v42_v2  ;;  %60 = vbcast.lane.b32.xlu1 %v104_v5, 256  ;;  %v74_v15 = vand.u32 127, %v73_v14  ;;  %v76_v16 = vshrl.u32 %v73_v14, 7  ;;  %s94_s2 = sshll.u32 %s184_s1, 4  ;;  %s95_s2 = int_to_ptr.vmem [resolvable:$true] %s94_s2 }
  0x1f   :  { %v47_v6 = vsel %vm46_vm0, %v44_v3, 0.0  ;;  %s153_s25 = scalar_lea.vmem %s95_s2, 32  ;;  %p158_p11 = scmp.lt.s32.totalorder %s95_s2, %s95_s2 }
  0x20   :  { %48 = vadd.xlane.f32.xlu0 %v47_v6  ;;  %v50_v7 = vsel %vm46_vm0, %v45_v4, 0.0  ;;  %v77_v17 = vsub.s32 %v74_v15, %v76_v16  ;;  %p154_p10 = scmp.ne.s32.totalorder %s95_s2, %s153_s25  ;;  %p159_p12 = scmp.lt.s32.totalorder %s153_s25, %s153_s25 }
  0x22   :  { %p160_p13 = por %p159_p12, %p158_p11 }
  0x24   :  { %51 = vadd.xlane.f32.xlu0 %v50_v7  ;;  %p161_p0 = pnand %p160_p13, %p154_p10 }
  0x90   :  { %v61_v9 = vpop.permute.xlu1 %60 }
  0xa9   :  { %v49_v10 = vpop.xlane.xlu0 %48 }
  0xaa   :  { %v63_v11 = vadd.f32 %v61_v9, %v49_v10 }
  0xac   :  { %68 = vperm.xlu1 %111, %v63_v11  }
  0xad   :  { %v52_v12 = vpop.xlane.xlu0 %51 }
  0xae   :  { %v64_v13 = vadd.f32 %v61_v9, %v52_v12 }
  0xb0   :  { %71 = vperm.xlu0 %112, %v64_v13  }
 0x127   :  { %v69_v18 = vpop.permute.xlu1 %68 }
 0x128   :  { %v78_v20 = vrot.slane %v69_v18, %v77_v17 }
 0x12b   :  { %v72_v19 = vpop.permute.xlu0 %71 }
 0x12c   :  { %v82_v21 = vrot.slane %v72_v19, %v77_v17 }
 0x12e   :  { %v84_v22 = vsel %vm83_vm1, %v82_v21, %v78_v20 }
 0x12f   :  { %87 = vst.msk [vmem:[#allocation7] sm:$0x3] %vm86_vm2, %v84_v22 }
 0x130   :  { %164 = shalt.err (!%p161_p0)
}
 0x131   :  { %97 = dma.vmem_to_hbm [thread:$0]  %s95_s2, 32, %s220_s3, [#allocation4]  }
 0x132   :  { %177 = dma.done.wait [#allocation4], 32  }
 0x133   :  { %178 = vsyncadd [#allocation4], 4294967264 }
 0x134   :  { %101 = vsyncpa [#allocation3], 1 }
 0x135   :  { %102 = vsyncpa [#allocation6], 1 }
 0x136   :  { %103 = vsyncpa [#allocation4], 1 }

</bundles_post_ra>
